<compile_context>
chip_gen: v7x
topology: tpu7x:2x2x1
jax: 0.10.0
libtpu: 0.0.40
codegen_flags: <defaults>
</compile_context>

<pallas_src>
import functools

import jax
import jax.numpy as jnp
from jax import lax
from jax.experimental import pallas as pl
from jax.experimental.pallas import tpu as pltpu

OUT_CHANNELS = 32
NEG_SLOPE = 0.2

_VMEM_LIMIT_BYTES = 32 * 1024 * 1024   # scoped VMEM limit, safe on v5e/v6e/v7x
_VMEM_DATA_BUDGET = 3 * 1024 * 1024    # ~1-2 MiB live blocks saturate HBM pipelining
_BN_CAP = 32                           # keep the in-kernel image loop short


def _tensorcores_per_chip():
    # Only v7x has 2 TensorCores per chip; all megacore-oriented splitting is
    # gated on this so v5e/v6e do not pay extra serial grid steps.
    try:
        kind = (getattr(jax.devices()[0], "device_kind", "") or "").lower()
        if "v7" in kind:
            return 2
    except Exception:
        pass
    return 1


def _conv31_lrelu_kernel(x_ref, wb_ref, o_ref, *, W):
    # x_ref : (bn, H*W)        flattened input images
    # wb_ref: (Cb, 4)          columns 0..2 = H-taps, column 3 = bias
    # o_ref : (bn, Cb, Ho*W)   lane-dense flattened output block
    bn = o_ref.shape[0]
    HoW = o_ref.shape[2]

    wb = wb_ref[...]                                  # (Cb, 4), hoisted once
    ones = jnp.ones((1, HoW), jnp.float32)            # bias tap (folded into MXU)

    def body(bi, carry):
        xb = x_ref[pl.ds(bi, 1), :]                   # (1, H*W)
        # Valid (3,1) conv along H == three shifted lane windows at 0, W, 2W.
        # NOTE: offsets k*W are not lane-aligned when W % 128 != 0; if the MLIR
        # shows relayout copies here, switch to pltpu.roll-based taps (XLU slot
        # is otherwise idle).
        taps = jnp.concatenate(
            [xb[:, k * W:k * W + HoW] for k in range(3)] + [ones],
            axis=0)                                   # (4, HoW)
        # K=4 matmul on the otherwise-idle MXU (bias folded in via the ones
        # tap); the VPU only does the LeakyReLU (mul + max).
        y = jnp.dot(wb, taps, preferred_element_type=jnp.float32)   # (Cb, HoW)
        o_ref[bi] = jnp.maximum(y, NEG_SLOPE * y)
        return carry

    lax.fori_loop(0, bn, body, 0, unroll=2)


def random_cnn_v1_forward(x_nchw, weight, bias):
    """x_nchw: (N, 1, H, W); weight: (C, 1, 3, 1); bias: (C,) -> (N, C, H-2, W)."""
    N, Cin, H, W = x_nchw.shape
    assert Cin == 1
    assert H >= 3, "kernel height 3 valid conv needs H >= 3"
    C = weight.shape[0]
    Ho = H - 2
    HW, HoW = H * W, Ho * W

    x_flat = x_nchw.reshape(N, HW).astype(jnp.float32)
    wb = jnp.concatenate(
        [weight[:, 0, :, 0].astype(jnp.float32),
         bias.reshape(C, 1).astype(jnp.float32)], axis=1)            # (C, 4)

    cores = _tensorcores_per_chip()

    # Images per grid step: small blocks already saturate the HBM pipeline.
    # No batch padding / output slicing: bn either covers the whole batch or is
    # a multiple of 8 with the tail grid block masked by Pallas boundary DMAs.
    per_image_bytes = 2 * 4 * (HW + C * HoW)          # double-buffered in + out
    bn_max = max(1, min(_BN_CAP, _VMEM_DATA_BUDGET // per_image_bytes))
    if cores >= 2 and N >= 2:
        bn_max = min(bn_max, pl.cdiv(N, 2))           # keep both v7x cores busy
    bn = N if N <= bn_max else max(8, (bn_max // 8) * 8)
    n_steps = pl.cdiv(N, bn)

    # Channel split only when the batch axis alone cannot feed two TensorCores.
    cblocks = 2 if (cores >= 2 and n_steps < 2 and C >= 16 and C % 16 == 0) else 1
    Cb = C // cblocks

    kernel = functools.partial(_conv31_lrelu_kernel, W=W)

    out_flat = pl.pallas_call(
        kernel,
        out_shape=jax.ShapeDtypeStruct((N, C, HoW), jnp.float32),
        grid_spec=pltpu.PrefetchScalarGridSpec(
            num_scalar_prefetch=0,
            grid=(n_steps, cblocks),
            in_specs=[
                pl.BlockSpec((bn, HW), lambda n, c: (n, 0)),
                pl.BlockSpec((Cb, 4), lambda n, c: (c, 0)),
            ],
            out_specs=pl.BlockSpec((bn, Cb, HoW), lambda n, c: (n, c, 0)),
        ),
        compiler_params=pltpu.CompilerParams(
            dimension_semantics=("parallel", "parallel"),
            vmem_limit_bytes=_VMEM_LIMIT_BYTES,
        ),
    )(x_flat, wb)

    return out_flat.reshape(N, C, Ho, W)


def _reference(x_nchw, weight, bias):
    # Plain-JAX reference: NCHW conv, kernel (3,1), valid padding, LeakyReLU.
    y = lax.conv_general_dilated(
        x_nchw, weight,
        window_strides=(1, 1), padding="VALID",
        dimension_numbers=("NCHW", "OIHW", "NCHW"))
    y = y + bias.reshape(1, -1, 1, 1)
    return jnp.where(y >= 0, y, NEG_SLOPE * y)


if __name__ == "__main__":
    key = jax.random.PRNGKey(0)
    kx, kw, kb = jax.random.split(key, 3)

    N, H, W = 2, 16, 16
    x = jax.random.normal(kx, (N, 1, H, W), dtype=jnp.float32)

    # Module-style init: weight ~ randn((32, 1, 3, 1)), bias = zeros((32,)).
    weight = jax.random.normal(kw, (OUT_CHANNELS, 1, 3, 1), dtype=jnp.float32)
    bias_module = jnp.zeros((OUT_CHANNELS,), dtype=jnp.float32)
    # Also check with a non-zero bias so the ones-tap bias path is exercised.
    bias_random = jax.random.normal(kb, (OUT_CHANNELS,), dtype=jnp.float32)

    for bias in (bias_module, bias_random):
        out = jax.block_until_ready(random_cnn_v1_forward(x, weight, bias))
        ref = _reference(x, weight, bias)
        assert out.shape == (N, OUT_CHANNELS, H - 2, W)
        assert jnp.allclose(out, ref, atol=1e-4, rtol=1e-4)

    print("KERNEL_OK")
</pallas_src>

<mosaic_0001>
module attributes {stable_mosaic.version = 11 : i64} {
  func.func @_conv31_lrelu_kernel(%arg0: i32, %arg1: i32, %arg2: memref<2x256xf32, #tpu.memory_space<vmem>>, %arg3: memref<32x4xf32, #tpu.memory_space<vmem>>, %arg4: memref<2x32x224xf32, #tpu.memory_space<vmem>>) attributes {dimension_semantics = [#tpu.dimension_semantics<parallel>, #tpu.dimension_semantics<parallel>], iteration_bounds = array<i64: 1, 1>, scalar_prefetch = 0 : i64, scratch_operands = 0 : i64, tpu.core_type = #tpu.core_type<tc>, window_params = [{transform_indices = @transform_0, window_bounds = array<i64: 2, 256>}, {transform_indices = @transform_1, window_bounds = array<i64: 32, 4>}, {transform_indices = @transform_2, window_bounds = array<i64: 2, 32, 224>}]} {
    %c0 = arith.constant 0 : index
    %c0_0 = arith.constant 0 : index
    %0 = vector.load %arg3[%c0, %c0_0] : memref<32x4xf32, #tpu.memory_space<vmem>>, vector<32x4xf32>
    %cst = arith.constant 1.000000e+00 : f32
    %1 = vector.broadcast %cst : f32 to vector<1x224xf32>
    %c0_i32 = arith.constant 0 : i32
    %2 = arith.index_cast %c0_i32 : i32 to index
    %c0_1 = arith.constant 0 : index
    %3 = vector.load %arg2[%2, %c0_1] : memref<2x256xf32, #tpu.memory_space<vmem>>, vector<1x256xf32>
    %4 = vector.extract_strided_slice %3 {offsets = [0, 0], sizes = [1, 224], strides = [1, 1]} : vector<1x256xf32> to vector<1x224xf32>
    %5 = vector.extract_strided_slice %3 {offsets = [0, 16], sizes = [1, 224], strides = [1, 1]} : vector<1x256xf32> to vector<1x224xf32>
    %6 = vector.extract_strided_slice %3 {offsets = [0, 32], sizes = [1, 224], strides = [1, 1]} : vector<1x256xf32> to vector<1x224xf32>
    %7 = tpu.concatenate %4, %5, %6, %1 in 0 : vector<1x224xf32>, vector<1x224xf32>, vector<1x224xf32>, vector<1x224xf32> -> vector<4x224xf32>
    %cst_2 = arith.constant dense<0.000000e+00> : vector<32x224xf32>
    %8 = tpu.matmul %0, %7, %cst_2 {dimension_numbers = #tpu.dot_dimension_numbers<[1], [0], [0], [1], [0, 0, 1, 1], [], []>} : vector<32x4xf32>, vector<4x224xf32>, vector<32x224xf32> -> vector<32x224xf32>
    %cst_3 = arith.constant 2.000000e-01 : f32
    %9 = vector.broadcast %cst_3 : f32 to vector<32x224xf32>
    %10 = arith.mulf %9, %8 : vector<32x224xf32>
    %11 = arith.maximumf %8, %10 : vector<32x224xf32>
    %12 = arith.index_cast %c0_i32 : i32 to index
    %c0_4 = arith.constant 0 : index
    %c0_5 = arith.constant 0 : index
    %13 = vector.load %arg4[%12, %c0_4, %c0_5] : memref<2x32x224xf32, #tpu.memory_space<vmem>>, vector<1x32x224xf32>
    %14 = vector.shape_cast %13 : vector<1x32x224xf32> to vector<32x224xf32>
    %15 = vector.shape_cast %11 : vector<32x224xf32> to vector<1x32x224xf32>
    tpu.vector_store %arg4[%12, %c0_4, %c0_5], %15 {strides = array<i32>} : memref<2x32x224xf32, #tpu.memory_space<vmem>>, vector<1x32x224xf32>,
    %c1_i32 = arith.constant 1 : i32
    %16 = arith.index_cast %c1_i32 : i32 to index
    %c0_6 = arith.constant 0 : index
    %17 = vector.load %arg2[%16, %c0_6] : memref<2x256xf32, #tpu.memory_space<vmem>>, vector<1x256xf32>
    %18 = vector.extract_strided_slice %17 {offsets = [0, 0], sizes = [1, 224], strides = [1, 1]} : vector<1x256xf32> to vector<1x224xf32>
    %19 = vector.extract_strided_slice %17 {offsets = [0, 16], sizes = [1, 224], strides = [1, 1]} : vector<1x256xf32> to vector<1x224xf32>
    %20 = vector.extract_strided_slice %17 {offsets = [0, 32], sizes = [1, 224], strides = [1, 1]} : vector<1x256xf32> to vector<1x224xf32>
    %21 = tpu.concatenate %18, %19, %20, %1 in 0 : vector<1x224xf32>, vector<1x224xf32>, vector<1x224xf32>, vector<1x224xf32> -> vector<4x224xf32>
    %cst_7 = arith.constant dense<0.000000e+00> : vector<32x224xf32>
    %22 = tpu.matmul %0, %21, %cst_7 {dimension_numbers = #tpu.dot_dimension_numbers<[1], [0], [0], [1], [0, 0, 1, 1], [], []>} : vector<32x4xf32>, vector<4x224xf32>, vector<32x224xf32> -> vector<32x224xf32>
    %cst_8 = arith.constant 2.000000e-01 : f32
    %23 = vector.broadcast %cst_8 : f32 to vector<32x224xf32>
    %24 = arith.mulf %23, %22 : vector<32x224xf32>
    %25 = arith.maximumf %22, %24 : vector<32x224xf32>
    %26 = arith.index_cast %c1_i32 : i32 to index
    %c0_9 = arith.constant 0 : index
    %c0_10 = arith.constant 0 : index
    %27 = vector.load %arg4[%26, %c0_9, %c0_10] : memref<2x32x224xf32, #tpu.memory_space<vmem>>, vector<1x32x224xf32>
    %28 = vector.shape_cast %27 : vector<1x32x224xf32> to vector<32x224xf32>
    %29 = vector.shape_cast %25 : vector<32x224xf32> to vector<1x32x224xf32>
    tpu.vector_store %arg4[%26, %c0_9, %c0_10], %29 {strides = array<i32>} : memref<2x32x224xf32, #tpu.memory_space<vmem>>, vector<1x32x224xf32>,
    %c2_i32 = arith.constant 2 : i32
    return
  }
  func.func @transform_0(%arg0: i32, %arg1: i32) -> (i32, i32) {
    %c0_i32 = arith.constant 0 : i32
    %c0_i32_0 = arith.constant 0 : i32
    return %arg0, %c0_i32 : i32, i32
  }
  func.func @transform_1(%arg0: i32, %arg1: i32) -> (i32, i32) {
    %c0_i32 = arith.constant 0 : i32
    %c0_i32_0 = arith.constant 0 : i32
    return %arg1, %c0_i32 : i32, i32
  }
  func.func @transform_2(%arg0: i32, %arg1: i32) -> (i32, i32, i32) {
    %c0_i32 = arith.constant 0 : i32
    %c0_i32_0 = arith.constant 0 : i32
    return %arg0, %arg1, %c0_i32 : i32, i32, i32
  }
}

</mosaic_0001>

<bundles_post_ra>
// kernel: tpu_custom_call.1
= control target key start
LH: loop header
LB: loop body
LE: loop exit
PB: predicated region body
PF: predicated region fallthrough
CT: control target
= control target key end

     0   :  { %v18_v0 = vlaneseq  ;;  %s483_s0 = inlined_call_operand.vmem [shape: f32[2,256], index: 0, kind: input, shape index: {}]   ;;  %s484_s1 = inlined_call_operand.vmem [shape: f32[32,4], index: 1, kind: input, shape index: {}]   ;;  %s485_s2 = inlined_call_operand.hbm [shape: f32[2,32,224], index: 2, kind: output, shape index: {}]  }
   0x1   :  { %7 = vsyncpa [#allocation3], 0  ;;  %v361_v2 = vld [vmem:[%s483_s0 + $0x1] ss:$2 sm:$0x3]  ;;  %s398_s13 = smov 112  }
   0x2   :  { %v19_v1 = vshrl.u32 %v18_v0, 7  ;;  %v16_v3 = vld [vmem:[%s483_s0] ss:$2 sm:$0x3]  ;;  %v399_v10 = vmov 0.0   ;;  %s400_s14 = smov 96  }
   0x3   :  { %137 = vmatprep.mubr.f32.mxu0 %v399_v10  ;;  %289 = vmatprep.mubr.f32.mxu1 %v399_v10  ;;  %vm32_vm0 = vcmask 916480   ;;  %vm44_vm1 = vcmask 1040384   ;;  %vm40_vm2 = vcmask 785408   ;;  %vm47_vm3 = vcmask 1041408   ;;  %v12_v25 = vld [vmem:[%s484_s1] sm:$0xff]  ;;  %v13_v35 = vld [vmem:[%s484_s1 + $0x8] sm:$0xff] }
   0x4   :  { %v20_v4 = vsub.s32 0, %v19_v1  ;;  %v24_v5 = vsub.s32 1, %v19_v1  ;;  %vm50_vm4 = vcmask 1042432   ;;  %vm66_vm5 = vcmask 1043456   ;;  %v14_v37 = vld [vmem:[%s484_s1 + $0x10] sm:$0xff]  ;;  %v15_v38 = vld [vmem:[%s484_s1 + $0x18] sm:$0xff] }
   0x5   :  { %vm53_vm6 = vcmask 31744   ;;  %s401_s1 = smov [#allocation2]  }
   0x6   :  { %v192_v6 = vrot.slane %v361_v2, %v20_v4  ;;  %v21_v7 = vrot.slane %v16_v3, %v20_v4  ;;  %v196_v8 = vrot.slane %v361_v2, %v24_v5  ;;  %v25_v9 = vrot.slane %v16_v3, %v24_v5  ;;  %s344_s22 = sshll.u32 %s401_s1, 4  ;;  %s345_s22 = int_to_ptr.vmem [resolvable:$true] %s344_s22 }
   0x7   :  { %s374_s23 = scalar_lea.vmem %s345_s22, 2048  ;;  %p379_p1 = scmp.lt.s32.totalorder %s345_s22, %s345_s22 }
   0x8   :  { %199 = vrot.lane.b32.xlu1 %v192_v6, %s398_s13  ;;  %28 = vrot.lane.b32.xlu0 %v21_v7, %s398_s13  ;;  %p375_p0 = scmp.ne.s32.totalorder %s345_s22, %s374_s23  ;;  %p380_p2 = scmp.lt.s32.totalorder %s374_s23, %s374_s23 }
   0xa   :  { %p381_p3 = por %p380_p2, %p379_p1 }
   0xc   :  { %201 = vrot.lane.b32.xlu1 %v196_v8, %s398_s13  ;;  %30 = vrot.lane.b32.xlu0 %v25_v9, %s398_s13  ;;  %p382_p4 = pnand %p381_p3, %p375_p0 }
  0x10   :  { %38 = vrot.lane.b32.xlu1 %v25_v9, %s400_s14  ;;  %36 = vrot.lane.b32.xlu0 %v21_v7, %s400_s14 }
  0x14   :  { %208 = vrot.lane.b32.xlu1 %v196_v8, %s400_s14  ;;  %206 = vrot.lane.b32.xlu0 %v192_v6, %s400_s14 }
  0x7a   :  { %v200_v11 = vpop.permute.xlu1 %199  ;;  %v29_v12 = vpop.permute.xlu0 %28 }
  0x7e   :  { %v202_v13 = vpop.permute.xlu1 %201  ;;  %v31_v14 = vpop.permute.xlu0 %30 }
  0x7f   :  { %v33_v15 = vsel %vm32_vm0, %v29_v12, %v31_v14  ;;  %v46_v16 = vsel %vm44_vm1, %v25_v9, %v31_v14  ;;  %v203_v22 = vsel %vm32_vm0, %v200_v11, %v202_v13  ;;  %v214_v27 = vsel %vm44_vm1, %v196_v8, %v202_v13 }
  0x80   :  { %v45_v19 = vsel %vm44_vm1, %v21_v7, %v33_v15  ;;  %v213_v30 = vsel %vm44_vm1, %v192_v6, %v203_v22 }
  0x82   :  { %v39_v17 = vpop.permute.xlu1 %38  ;;  %v37_v18 = vpop.permute.xlu0 %36 }
  0x83   :  { %v41_v20 = vsel %vm40_vm2, %v37_v18, %v39_v17  ;;  %v49_v21 = vsel %vm47_vm3, %v46_v16, %v39_v17 }
  0x84   :  { %v52_v23 = vsel %vm50_vm4, %v49_v21, 1.0  ;;  %v48_v24 = vsel %vm47_vm3, %v45_v19, %v41_v20 }
  0x85   :  { %355 = vmatprep.subr.msk.mxu0 %vm66_vm5, %v52_v23  ;;  %v51_v26 = vsel %vm50_vm4, %v48_v24, 1.0 }
  0x86   :  { %v209_v28 = vpop.permute.xlu1 %208  ;;  %356 = vmatpush1.msk.msra.mxu0 %vm66_vm5, %v51_v26  ;;  %v207_v29 = vpop.permute.xlu0 %206 }
  0x87   :  { %v210_v31 = vsel %vm40_vm2, %v207_v29, %v209_v28  ;;  %357 = vmatmul.mubr.msk.f32.vlgmr.msra.gmra.mrb[0].mxu0 %vm53_vm6, %v12_v25  ;;  %v216_v32 = vsel %vm47_vm3, %v214_v27, %v209_v28 }
  0x88   :  { %v218_v33 = vsel %vm50_vm4, %v216_v32, 1.0  ;;  %v215_v34 = vsel %vm47_vm3, %v213_v30, %v210_v31  ;;  %143 = vmatprep.mubr.f32.mxu0 %v399_v10 }
  0x89   :  { %362 = vmatprep.subr.msk.mxu1 %vm66_vm5, %v218_v33  ;;  %v217_v36 = vsel %vm50_vm4, %v215_v34, 1.0 }
  0x8a   :  { %363 = vmatpush1.msk.msra.mxu1 %vm66_vm5, %v217_v36 }
  0x8b   :  { %364 = vmatmul.mubr.msk.f32.vlgmr.msra.gmra.mrb[0].mxu1 %vm53_vm6, %v12_v25  ;;  %358 = vmatmul.mubr.msk.f32.gmra.mrb[2].mxu0 %vm53_vm6, %v13_v35 }
  0x8c   :  { %295 = vmatprep.mubr.f32.mxu1 %v399_v10  ;;  %149 = vmatprep.mubr.f32.mxu0 %v399_v10 }
  0x8f   :  { %365 = vmatmul.mubr.msk.f32.gmra.mrb[2].mxu1 %vm53_vm6, %v13_v35  ;;  %359 = vmatmul.mubr.msk.f32.gmra.mrb[4].mxu0 %vm53_vm6, %v14_v37 }
  0x90   :  { %301 = vmatprep.mubr.f32.mxu1 %v399_v10  ;;  %155 = vmatprep.mubr.f32.mxu0 %v399_v10 }
  0x93   :  { %366 = vmatmul.mubr.msk.f32.gmra.mrb[4].mxu1 %vm53_vm6, %v14_v37  ;;  %360 = vmatmul.mubr.msk.f32.gmra.mrb[6].mxu0 %vm53_vm6, %v15_v38 }
  0x94   :  { %307 = vmatprep.mubr.f32.mxu1 %v399_v10 }
  0x97   :  { %367 = vmatmul.mubr.msk.f32.gmra.mrb[6].mxu1 %vm53_vm6, %v15_v38 }
 0x15a   :  { %v139_v39 = vpop.f32.mrb[0].mxu0 }
 0x15b   :  { %v162_v40 = vmul.f32 0.2, %v139_v39  ;;  %v141_v41 = vpop.f32.mrb[1].mxu0 }
 0x15c   :  { %v163_v42 = vmul.f32 0.2, %v141_v41 }
 0x15d   :  { %v170_v43 = vmax.f32 %v139_v39, %v162_v40 }
 0x15e   :  { %v171_v44 = vmax.f32 %v141_v41, %v163_v42  ;;  %v291_v45 = vpop.f32.mrb[0].mxu1  ;;  %v145_v46 = vpop.f32.mrb[2].mxu0 }
 0x15f   :  { %178 = vst [vmem:[#allocation2] sm:$0xff] %v170_v43  ;;  %v314_v47 = vmul.f32 0.2, %v291_v45  ;;  %v164_v48 = vmul.f32 0.2, %v145_v46  ;;  %v293_v49 = vpop.f32.mrb[1].mxu1 }
 0x160   :  { %v147_v50 = vpop.f32.mrb[3].mxu0  ;;  %179 = vst.msk [vmem:[#allocation2 + $0x8] sm:$0xff] %vm40_vm2, %v171_v44  ;;  %v315_v51 = vmul.f32 0.2, %v293_v49 }
 0x161   :  { %v165_v52 = vmul.f32 0.2, %v147_v50  ;;  %v322_v53 = vmax.f32 %v291_v45, %v314_v47  ;;  %v172_v54 = vmax.f32 %v145_v46, %v164_v48 }
 0x162   :  { %v323_v55 = vmax.f32 %v293_v49, %v315_v51  ;;  %v297_v57 = vpop.f32.mrb[2].mxu1  ;;  %v151_v58 = vpop.f32.mrb[4].mxu0 }
 0x163   :  { %v173_v56 = vmax.f32 %v147_v50, %v165_v52  ;;  %331 = vst [vmem:[#allocation2 + $0x40] sm:$0xff] %v322_v53  ;;  %180 = vst [vmem:[#allocation2 + $0x10] sm:$0xff] %v172_v54  ;;  %v316_v59 = vmul.f32 0.2, %v297_v57  ;;  %v166_v60 = vmul.f32 0.2, %v151_v58 }
 0x164   :  { %v299_v61 = vpop.f32.mrb[3].mxu1  ;;  %v153_v62 = vpop.f32.mrb[5].mxu0  ;;  %332 = vst.msk [vmem:[#allocation2 + $0x48] sm:$0xff] %vm40_vm2, %v323_v55 }
 0x165   :  { %181 = vst.msk [vmem:[#allocation2 + $0x18] sm:$0xff] %vm40_vm2, %v173_v56  ;;  %v317_v63 = vmul.f32 0.2, %v299_v61  ;;  %v167_v0 = vmul.f32 0.2, %v153_v62  ;;  %v324_v1 = vmax.f32 %v297_v57, %v316_v59  ;;  %v174_v2 = vmax.f32 %v151_v58, %v166_v60 }
 0x166   :  { %v303_v5 = vpop.f32.mrb[4].mxu1  ;;  %v157_v6 = vpop.f32.mrb[6].mxu0 }
 0x167   :  { %v325_v3 = vmax.f32 %v299_v61, %v317_v63  ;;  %v175_v4 = vmax.f32 %v153_v62, %v167_v0  ;;  %333 = vst [vmem:[#allocation2 + $0x50] sm:$0xff] %v324_v1  ;;  %182 = vst [vmem:[#allocation2 + $0x20] sm:$0xff] %v174_v2  ;;  %v318_v7 = vmul.f32 0.2, %v303_v5  ;;  %v168_v8 = vmul.f32 0.2, %v157_v6 }
 0x168   :  { %v305_v9 = vpop.f32.mrb[5].mxu1  ;;  %v159_v10 = vpop.f32.mrb[7].mxu0 }
 0x169   :  { %334 = vst.msk [vmem:[#allocation2 + $0x58] sm:$0xff] %vm40_vm2, %v325_v3  ;;  %183 = vst.msk [vmem:[#allocation2 + $0x28] sm:$0xff] %vm40_vm2, %v175_v4  ;;  %v319_v11 = vmul.f32 0.2, %v305_v9  ;;  %v169_v12 = vmul.f32 0.2, %v159_v10  ;;  %v326_v13 = vmax.f32 %v303_v5, %v318_v7  ;;  %v176_v14 = vmax.f32 %v157_v6, %v168_v8 }
 0x16a   :  { %v309_v17 = vpop.f32.mrb[6].mxu1 }
 0x16b   :  { %v327_v15 = vmax.f32 %v305_v9, %v319_v11  ;;  %v177_v16 = vmax.f32 %v159_v10, %v169_v12  ;;  %335 = vst [vmem:[#allocation2 + $0x60] sm:$0xff] %v326_v13  ;;  %184 = vst [vmem:[#allocation2 + $0x30] sm:$0xff] %v176_v14  ;;  %v320_v18 = vmul.f32 0.2, %v309_v17  ;;  %v311_v19 = vpop.f32.mrb[7].mxu1 }
 0x16c   :  { %v321_v20 = vmul.f32 0.2, %v311_v19 }
 0x16d   :  { %336 = vst.msk [vmem:[#allocation2 + $0x68] sm:$0xff] %vm40_vm2, %v327_v15  ;;  %185 = vst.msk [vmem:[#allocation2 + $0x38] sm:$0xff] %vm40_vm2, %v177_v16  ;;  %v328_v21 = vmax.f32 %v309_v17, %v320_v18 }
 0x16e   :  { %v329_v22 = vmax.f32 %v311_v19, %v321_v20 }
 0x16f   :  { %337 = vst [vmem:[#allocation2 + $0x70] sm:$0xff] %v328_v21 }
 0x170   :  { %338 = vst.msk [vmem:[#allocation2 + $0x78] sm:$0xff] %vm40_vm2, %v329_v22 }
 0x171   :  { %385 = shalt.err (!%p382_p4)
}
 0x172   :  { %s386_s26 = scalar_lea.hbm %s485_s2, 2048 }
 0x173   :  { %p387_p5 = scmp.ne.s32.totalorder %s485_s2, %s386_s26  ;;  %p390_p6 = scmp.lt.u32.totalorder %s386_s26, %s485_s2 }
 0x175   :  { %p392_p7 = pnand %p390_p6, %p387_p5 }
 0x177   :  { %395 = shalt.err (!%p392_p7)
}
 0x178   :  { %s402_s3 = smov 256   ;;  %s403_s4 = smov 16  }
 0x179   :  { %350 = dma.vmem_to_hbm [thread:$0]  %s345_s22, 2048, %s485_s2, [#allocation3], %s402_s3, %s402_s3, %s403_s4  }
 0x17a   :  { %396 = dma.done.wait [#allocation3], 2048  }
 0x17b   :  { %397 = vsyncadd [#allocation3], 4294965248 }
 0x17c   :  { %354 = vsyncpa [#allocation3], 1 }

</bundles_post_ra>
